<compile_context>
chip_gen: v7x
topology: tpu7x:2x2x1
jax: 0.10.0
libtpu: 0.0.40
codegen_flags: <defaults>
</compile_context>

<pallas_src>
import jax
import jax.numpy as jnp
from jax.experimental import pallas as pl
from jax.experimental.pallas import tpu as pltpu


def _row_sse_lane_kernel(pred_ref, gt_ref, out_ref):
    """Per-row SSE as 128-lane partial sums (requires HW % 128 == 0). Pure VALU."""
    d = pred_ref[...].astype(jnp.float32) - gt_ref[...].astype(jnp.float32)
    sq = d * d
    hw = sq.shape[-1]
    acc = sq[:, 0:128]
    for g in range(1, hw // 128):            # static unroll; lane-aligned slices (no relayout)
        acc = acc + sq[:, g * 128:(g + 1) * 128]
    out_ref[...] = acc                       # (tile_rows, 128) lane-dense store


def _row_sse_narrow_kernel(pred_ref, gt_ref, out_ref):
    """Per-row SSE when HW is not a multiple of 128 (e.g. tiny 8x8 heatmaps)."""
    d = pred_ref[...].astype(jnp.float32) - gt_ref[...].astype(jnp.float32)
    out_ref[...] = jnp.sum(d * d, axis=-1, keepdims=True)   # (tile_rows, 1)


def _vmem_capacity_bytes():
    try:
        return int(pltpu.get_tpu_info().vmem_capacity_bytes)
    except Exception:
        return 64 << 20      # conservative fallback (v7x-sized)


def _ceil_to(x, m):
    return -(-x // m) * m


def joints_mse_loss(output, target, target_weight=None, use_target_weight=True,
                    max_tile_bytes=None):
    """output, target: (B, J, H, W); target_weight: (B, J, 1). Returns scalar f32 loss."""
    B, J, H, W = output.shape
    HW = H * W
    rows = B * J

    if use_target_weight and target_weight is None:
        raise ValueError("use_target_weight=True requires target_weight")

    # Contiguous reshapes only (free) — the loss does not care which row is which joint.
    pred = output.reshape(rows, HW)
    gt = target.reshape(rows, HW)

    itemsize = max(jnp.dtype(pred.dtype).itemsize, jnp.dtype(gt.dtype).itemsize)
    min_itemsize = min(jnp.dtype(pred.dtype).itemsize, jnp.dtype(gt.dtype).itemsize)
    sub = max(8, 32 // min_itemsize)          # sublane multiple: 8 (f32), 16 (bf16)

    vmem_cap = _vmem_capacity_bytes()
    if max_tile_bytes is None:
        # ~12 MiB/input on 128 MiB chips (v5e/v6e), ~6.4 MiB on 64 MiB v7x.
        max_tile_bytes = max(2 << 20, min(12 << 20, vmem_cap // 10))

    rows_aligned = _ceil_to(rows, sub)
    budget_rows = max(sub, (max_tile_bytes // max(1, HW * itemsize)) // sub * sub)
    tile_rows = min(budget_rows, rows_aligned)
    # v7x megacore: prefer >=2 independent row tiles when there's non-trivial work,
    # so both TensorCores stream half the rows each.
    per_input_bytes = rows * HW * itemsize
    if tile_rows >= rows_aligned and rows_aligned >= 2 * sub and per_input_bytes > (2 << 20):
        half = max(sub, _ceil_to(rows_aligned // 2, sub))
        tile_rows = min(tile_rows, half)

    num_tiles = -(-rows // tile_rows)
    padded_rows = num_tiles * tile_rows       # output padded so no OOB output writes

    lanes = 128 if HW % 128 == 0 else 1
    kernel = _row_sse_lane_kernel if lanes == 128 else _row_sse_narrow_kernel

    partial = pl.pallas_call(
        kernel,
        out_shape=jax.ShapeDtypeStruct((padded_rows, lanes), jnp.float32),
        grid=(num_tiles,),
        in_specs=[
            pl.BlockSpec((tile_rows, HW), lambda t: (t, 0)),
            pl.BlockSpec((tile_rows, HW), lambda t: (t, 0)),
        ],
        out_specs=pl.BlockSpec((tile_rows, lanes), lambda t: (t, 0)),
        compiler_params=pltpu.CompilerParams(
            dimension_semantics=("parallel",),
            vmem_limit_bytes=int(vmem_cap * 7 // 8),
        ),
    )(pred, gt)

    # Garbage rows from the ragged last tile (if any) are dropped here.
    row_sse = jnp.sum(partial[:rows], axis=-1)            # (rows,) f32
    if use_target_weight:
        w = target_weight.reshape(rows).astype(jnp.float32)
        total = jnp.sum(row_sse * (w * w))                 # sum_p (w*(p-g))^2 == w^2*sum_p(p-g)^2
    else:
        total = jnp.sum(row_sse)
    return 0.5 * total / jnp.float32(rows * HW)


def _reference(output, target, target_weight, use_target_weight=True):
    """Direct transcription of the PyTorch module (per-joint MSE mean, averaged)."""
    B, J, H, W = output.shape
    pred = output.reshape(B, J, -1).astype(jnp.float32)
    gt = target.reshape(B, J, -1).astype(jnp.float32)
    loss = 0.0
    for idx in range(J):
        hp = pred[:, idx, :]
        hg = gt[:, idx, :]
        if use_target_weight:
            w = target_weight[:, idx].astype(jnp.float32)   # (B, 1)
            hp = hp * w
            hg = hg * w
        loss = loss + 0.5 * jnp.mean((hp - hg) ** 2)
    return loss / J


if __name__ == "__main__":
    key = jax.random.PRNGKey(0)

    def check(B, J, H, W, use_target_weight, dtype=jnp.float32,
              max_tile_bytes=None, seed_offset=0, rtol=1e-5, atol=1e-6):
        k1, k2, k3 = jax.random.split(jax.random.fold_in(key, seed_offset), 3)
        output = jax.random.normal(k1, (B, J, H, W), dtype=jnp.float32).astype(dtype)
        target = jax.random.normal(k2, (B, J, H, W), dtype=jnp.float32).astype(dtype)
        target_weight = jax.random.uniform(k3, (B, J, 1), dtype=jnp.float32)
        loss = joints_mse_loss(output, target, target_weight,
                               use_target_weight=use_target_weight,
                               max_tile_bytes=max_tile_bytes)
        loss = jax.block_until_ready(loss)
        ref = _reference(output, target, target_weight, use_target_weight)
        assert jnp.allclose(loss, ref, rtol=rtol, atol=atol), (B, J, H, W, loss, ref)

    # Canonical small case (HW=256 -> lane-dense path, single tile), weighted + unweighted.
    check(2, 4, 16, 16, True)
    check(2, 4, 16, 16, False)
    # Tiny tile budget forces multiple independent row tiles (multi-step "parallel" grid).
    check(4, 8, 16, 16, True, max_tile_bytes=8 * 1024, seed_offset=1)
    # rows = 15 (not sublane-aligned) and HW = 64 (narrow path): exercises the
    # pad-free ragged-tail handling and the keepdims-reduce kernel.
    check(3, 5, 8, 8, True, seed_offset=2)
    # bf16 inputs (halved HBM traffic); kernel upcasts to f32 internally.
    check(2, 4, 16, 16, True, dtype=jnp.bfloat16, seed_offset=3, rtol=1e-4, atol=1e-5)

    print("KERNEL_OK")
</pallas_src>

<mosaic_0001>
module attributes {stable_mosaic.version = 11 : i64} {
  func.func @_row_sse_lane_kernel(%arg0: i32, %arg1: memref<8x256xf32, #tpu.memory_space<vmem>>, %arg2: memref<8x256xf32, #tpu.memory_space<vmem>>, %arg3: memref<8x128xf32, #tpu.memory_space<vmem>>) attributes {dimension_semantics = [#tpu.dimension_semantics<parallel>], iteration_bounds = array<i64: 1>, scalar_prefetch = 0 : i64, scratch_operands = 0 : i64, tpu.core_type = #tpu.core_type<tc>, window_params = [{transform_indices = @transform_0, window_bounds = array<i64: 8, 256>}, {transform_indices = @transform_1, window_bounds = array<i64: 8, 256>}, {transform_indices = @transform_2, window_bounds = array<i64: 8, 128>}]} {
    %c0 = arith.constant 0 : index
    %c0_0 = arith.constant 0 : index
    %0 = vector.load %arg1[%c0, %c0_0] : memref<8x256xf32, #tpu.memory_space<vmem>>, vector<8x256xf32>
    %c0_1 = arith.constant 0 : index
    %c0_2 = arith.constant 0 : index
    %1 = vector.load %arg2[%c0_1, %c0_2] : memref<8x256xf32, #tpu.memory_space<vmem>>, vector<8x256xf32>
    %2 = arith.subf %0, %1 : vector<8x256xf32>
    %3 = arith.mulf %2, %2 : vector<8x256xf32>
    %4 = vector.extract_strided_slice %3 {offsets = [0, 0], sizes = [8, 128], strides = [1, 1]} : vector<8x256xf32> to vector<8x128xf32>
    %5 = vector.extract_strided_slice %3 {offsets = [0, 128], sizes = [8, 128], strides = [1, 1]} : vector<8x256xf32> to vector<8x128xf32>
    %6 = arith.addf %4, %5 : vector<8x128xf32>
    %c0_3 = arith.constant 0 : index
    %c0_4 = arith.constant 0 : index
    %7 = vector.load %arg3[%c0_3, %c0_4] : memref<8x128xf32, #tpu.memory_space<vmem>>, vector<8x128xf32>
    tpu.vector_store %arg3[%c0_3, %c0_4], %6 {strides = array<i32>} : memref<8x128xf32, #tpu.memory_space<vmem>>, vector<8x128xf32>,
    return
  }
  func.func @transform_0(%arg0: i32) -> (i32, i32) {
    %c0_i32 = arith.constant 0 : i32
    %c0_i32_0 = arith.constant 0 : i32
    return %arg0, %c0_i32 : i32, i32
  }
  func.func @transform_1(%arg0: i32) -> (i32, i32) {
    %c0_i32 = arith.constant 0 : i32
    %c0_i32_0 = arith.constant 0 : i32
    return %arg0, %c0_i32 : i32, i32
  }
  func.func @transform_2(%arg0: i32) -> (i32, i32) {
    %c0_i32 = arith.constant 0 : i32
    %c0_i32_0 = arith.constant 0 : i32
    return %arg0, %c0_i32 : i32, i32
  }
}

</mosaic_0001>

<bundles_post_ra>
// kernel: tpu_custom_call.1
= control target key start
LH: loop header
LB: loop body
LE: loop exit
PB: predicated region body
PF: predicated region fallthrough
CT: control target
= control target key end

     0   :  { %7 = vsyncpa [#allocation3], 0  ;;  %s191_s0 = inlined_call_operand.hbm [shape: f32[8,256], index: 0, kind: input, shape index: {}]   ;;  %s192_s1 = inlined_call_operand.hbm [shape: f32[8,256], index: 1, kind: input, shape index: {}]   ;;  %s193_s2 = inlined_call_operand.hbm [shape: f32[8,128], index: 2, kind: output, shape index: {}]  }
   0x1   :  { %8 = vsyncpa [#allocation6], 0 }
   0x2   :  { %9 = vsyncpa [#allocation4], 0  ;;  %s137_s9 = smov [#allocation2]   ;;  %s138_s11 = smov [#allocation5]  }
   0x3   :  { %s16_s10 = sshll.u32 %s137_s9, 4  ;;  %s26_s12 = sshll.u32 %s138_s11, 4  ;;  %s17_s10 = int_to_ptr.vmem [resolvable:$true] %s16_s10  ;;  %s27_s12 = int_to_ptr.vmem [resolvable:$true] %s26_s12 }
   0x4   :  { %s65_s15 = scalar_lea.hbm %s191_s0, 256 }
   0x5   :  { %p66_p0 = scmp.ne.s32.totalorder %s191_s0, %s65_s15  ;;  %p69_p1 = scmp.lt.u32.totalorder %s65_s15, %s191_s0 }
   0x7   :  { %p71_p2 = pnand %p69_p1, %p66_p0 }
   0x9   :  { %74 = shalt.err (!%p71_p2)
}
   0xa   :  { %s75_s20 = scalar_lea.vmem %s17_s10, 256  ;;  %p80_p4 = scmp.lt.s32.totalorder %s17_s10, %s17_s10 }
   0xb   :  { %p76_p3 = scmp.ne.s32.totalorder %s17_s10, %s75_s20  ;;  %p81_p5 = scmp.lt.s32.totalorder %s75_s20, %s75_s20 }
   0xd   :  { %p82_p6 = por %p81_p5, %p80_p4 }
   0xf   :  { %p83_p7 = pnand %p82_p6, %p76_p3 }
  0x11   :  { %86 = shalt.err (!%p83_p7)
}
  0x12   :  { %19 = dma.hbm_to_vmem [thread:$0]  %s191_s0, 256, %s17_s10, [#allocation3]  }
  0x13   :  { %s87_s25 = scalar_lea.hbm %s192_s1, 256 }
  0x14   :  { %p88_p8 = scmp.ne.s32.totalorder %s192_s1, %s87_s25  ;;  %p91_p9 = scmp.lt.u32.totalorder %s87_s25, %s192_s1 }
  0x16   :  { %p93_p10 = pnand %p91_p9, %p88_p8 }
  0x18   :  { %96 = shalt.err (!%p93_p10)
}
  0x19   :  { %s97_s30 = scalar_lea.vmem %s27_s12, 256  ;;  %p102_p12 = scmp.lt.s32.totalorder %s27_s12, %s27_s12 }
  0x1a   :  { %p98_p11 = scmp.ne.s32.totalorder %s27_s12, %s97_s30  ;;  %p103_p13 = scmp.lt.s32.totalorder %s97_s30, %s97_s30 }
  0x1c   :  { %p104_p0 = por %p103_p13, %p102_p12 }
  0x1e   :  { %p105_p1 = pnand %p104_p0, %p98_p11 }
  0x20   :  { %108 = shalt.err (!%p105_p1)
}
  0x21   :  { %29 = dma.hbm_to_vmem [thread:$0]  %s192_s1, 256, %s27_s12, [#allocation6]  }
  0x22   :  { %131 = dma.done.wait [#allocation3], 256  }
  0x23   :  { %132 = vsyncadd [#allocation3], 4294967040 }
  0x24   :  { %133 = dma.done.wait [#allocation6], 256  }
  0x25   :  { %134 = vsyncadd [#allocation6], 4294967040  ;;  %v36_v0 = vld [vmem:[#allocation2] sm:$0xff]  ;;  %v37_v1 = vld [vmem:[#allocation2 + $0x8] sm:$0xff]  ;;  %s139_s4 = smov [#allocation7]  }
  0x26   :  { %v38_v2 = vld [vmem:[#allocation5] sm:$0xff]  ;;  %v39_v3 = vld [vmem:[#allocation5 + $0x8] sm:$0xff]  ;;  %s52_s5 = sshll.u32 %s139_s4, 4  ;;  %s53_s5 = int_to_ptr.vmem [resolvable:$true] %s52_s5 }
  0x27   :  { %v40_v4 = vsub.f32 %v36_v0, %v38_v2  ;;  %v41_v5 = vsub.f32 %v37_v1, %v39_v3  ;;  %s109_s6 = scalar_lea.vmem %s53_s5, 128  ;;  %p114_p3 = scmp.lt.s32.totalorder %s53_s5, %s53_s5 }
  0x28   :  { %p110_p2 = scmp.ne.s32.totalorder %s53_s5, %s109_s6  ;;  %p115_p4 = scmp.lt.s32.totalorder %s109_s6, %s109_s6 }
  0x29   :  { %v42_v6 = vmul.f32 %v40_v4, %v40_v4  ;;  %v43_v7 = vmul.f32 %v41_v5, %v41_v5 }
  0x2a   :  { %p116_p5 = por %p115_p4, %p114_p3 }
  0x2b   :  { %v44_v8 = vadd.f32 %v43_v7, %v42_v6 }
  0x2c   :  { %p117_p6 = pnand %p116_p5, %p110_p2 }
  0x2d   :  { %45 = vst [vmem:[#allocation7] sm:$0xff] %v44_v8 }
  0x2e   :  { %120 = shalt.err (!%p117_p6)
}
  0x2f   :  { %s121_s8 = scalar_lea.hbm %s193_s2, 128 }
  0x30   :  { %p122_p7 = scmp.ne.s32.totalorder %s193_s2, %s121_s8  ;;  %p125_p8 = scmp.lt.u32.totalorder %s121_s8, %s193_s2 }
  0x32   :  { %p127_p9 = pnand %p125_p8, %p122_p7 }
  0x34   :  { %130 = shalt.err (!%p127_p9)
}
  0x35   :  { %55 = dma.vmem_to_hbm [thread:$0]  %s53_s5, 128, %s193_s2, [#allocation4]  }
  0x36   :  { %135 = dma.done.wait [#allocation4], 128  }
  0x37   :  { %136 = vsyncadd [#allocation4], 4294967168 }
  0x38   :  { %59 = vsyncpa [#allocation3], 1 }
  0x39   :  { %60 = vsyncpa [#allocation6], 1 }
  0x3a   :  { %61 = vsyncpa [#allocation4], 1 }

</bundles_post_ra>
